<compile_context>
chip_gen: v7x
topology: tpu7x:2x2x1
jax: 0.10.0
libtpu: 0.0.40
codegen_flags: <defaults>
</compile_context>

<pallas_src>
import jax
import jax.numpy as jnp
from jax.experimental import pallas as pl
from jax.experimental.pallas import tpu as pltpu


def _policy_kernel(x_ref, w1_ref, b1_ref, wh_ref, bh_ref, out_ref):
    # Layer 1: x @ W1 + b1, ReLU.  (bb, K) @ (K, H) on the MXU; bias add on VPU.
    h = jnp.maximum(
        jnp.dot(x_ref[...], w1_ref[...], preferred_element_type=jnp.float32)
        + b1_ref[...],
        0.0,
    )
    # Fused heads: columns of wh are [W2 | W2_], bh is [b2 | b2_].
    out_ref[...] = (
        jnp.dot(h, wh_ref[...], preferred_element_type=jnp.float32) + bh_ref[...]
    ).astype(out_ref.dtype)


def pack_policy_params(params):
    """One-time packing of the PyTorch-style parameters.

    params: w1 (num_inputs, hidden), b1 (1, hidden),
            w2/w2_ (hidden, num_outputs), b2/b2_ (1, num_outputs)
            (weights already stored transposed: [in_features, out_features])
    """
    w_head = jnp.concatenate([params["w2"], params["w2_"]], axis=1)
    b_head = jnp.concatenate([params["b2"], params["b2_"]], axis=1)
    return {
        "w1": params["w1"].astype(jnp.float32),
        "b1": params["b1"].astype(jnp.float32),
        "w_head": w_head.astype(jnp.float32),
        "b_head": b_head.astype(jnp.float32),
        "num_outputs": int(params["w2"].shape[1]),
    }


def policy_forward(x, packed, *, block_b=512):
    """Run the fused Policy forward pass.

    x      : (B, num_inputs) float32
    packed : output of pack_policy_params()
    returns: (mu, sigma_sq), each (B, num_outputs) float32
    """
    w1, b1 = packed["w1"], packed["b1"]
    wh, bh = packed["w_head"], packed["b_head"]
    num_outputs = packed["num_outputs"]

    B, K = x.shape
    H = w1.shape[1]      # hidden
    NO2 = wh.shape[1]    # 2 * num_outputs

    x = x.astype(jnp.float32)

    # Batch-only tiling.  Small batches (the common RL-rollout case) use a
    # single full-extent block with NO padding / extra copies in the wrapper.
    if B <= block_b:
        bb = B
        padded_b = B
    else:
        bb = block_b
        padded_b = pl.cdiv(B, bb) * bb
        if padded_b != B:
            x = jnp.pad(x, ((0, padded_b - B), (0, 0)))
    grid = (padded_b // bb,)

    cost = pl.CostEstimate(
        flops=2 * padded_b * (K * H + H * NO2),
        transcendentals=0,
        bytes_accessed=4 * (padded_b * K + K * H + H + H * NO2 + NO2
                            + padded_b * NO2),
    )

    out = pl.pallas_call(
        _policy_kernel,
        out_shape=jax.ShapeDtypeStruct((padded_b, NO2), jnp.float32),
        grid_spec=pltpu.PrefetchScalarGridSpec(
            num_scalar_prefetch=0,
            grid=grid,
            in_specs=[
                pl.BlockSpec((bb, K), lambda i: (i, 0)),    # activations (batch-tiled)
                pl.BlockSpec((K, H), lambda i: (0, 0)),     # W1         (VMEM-resident)
                pl.BlockSpec((1, H), lambda i: (0, 0)),     # b1         (VMEM-resident)
                pl.BlockSpec((H, NO2), lambda i: (0, 0)),   # [W2 | W2_] (VMEM-resident)
                pl.BlockSpec((1, NO2), lambda i: (0, 0)),   # [b2 | b2_] (VMEM-resident)
            ],
            out_specs=pl.BlockSpec((bb, NO2), lambda i: (i, 0)),
        ),
        compiler_params=pltpu.CompilerParams(
            dimension_semantics=("parallel",)),  # shard batch tiles over TCs (v7x)
        cost_estimate=cost,
    )(x, w1, b1, wh, bh)

    mu = out[:B, :num_outputs]
    sigma_sq = out[:B, num_outputs:]
    return mu, sigma_sq


def init_policy_params(key, num_inputs, hidden_size, num_outputs):
    """Deterministic parameter init (PyTorch nn.Linear-style uniform bounds)."""
    k1, k2, k3, k4, k5, k6 = jax.random.split(key, 6)

    def linear(kw, kb, fan_in, fan_out):
        bound = 1.0 / jnp.sqrt(fan_in)
        # stored already transposed: (in, out)
        w = jax.random.uniform(kw, (fan_in, fan_out), jnp.float32, -bound, bound)
        b = jax.random.uniform(kb, (1, fan_out), jnp.float32, -bound, bound)
        return w, b

    w1, b1 = linear(k1, k2, num_inputs, hidden_size)
    w2, b2 = linear(k3, k4, hidden_size, num_outputs)
    w2s, b2s = linear(k5, k6, hidden_size, num_outputs)
    return {"w1": w1, "b1": b1, "w2": w2, "b2": b2, "w2_": w2s, "b2_": b2s}


def _reference(x, params):
    h = jnp.maximum(x @ params["w1"] + params["b1"], 0.0)
    mu = h @ params["w2"] + params["b2"]
    sg = h @ params["w2_"] + params["b2_"]
    return mu, sg


if __name__ == "__main__":
    # Small shapes consistent with a continuous-control CartPole-like setup:
    # num_inputs=4 (observation dim), hidden=32, action dim=2.
    NUM_INPUTS, HIDDEN, NUM_OUTPUTS = 4, 32, 2

    key = jax.random.PRNGKey(0)
    kx, kp, kx2, kx3 = jax.random.split(key, 4)
    params = init_policy_params(kp, NUM_INPUTS, HIDDEN, NUM_OUTPUTS)
    packed = pack_policy_params(params)   # done once; amortized across steps

    # --- tiny batch (single grid step, full-extent blocks, zero wrapper copies) ---
    x_small = jax.random.normal(kx, (2, NUM_INPUTS), dtype=jnp.float32)
    mu, sigma_sq = policy_forward(x_small, packed)
    jax.block_until_ready((mu, sigma_sq))
    mu_ref, sg_ref = _reference(x_small, params)
    assert jnp.allclose(mu, mu_ref, atol=1e-5), "mu mismatch (B=2)"
    assert jnp.allclose(sigma_sq, sg_ref, atol=1e-5), "sigma_sq mismatch (B=2)"

    # --- larger batch exercising the batch-tiled / parallel grid path ---
    x_big = jax.random.normal(kx2, (1024, NUM_INPUTS), dtype=jnp.float32)
    mu_b, sg_b = policy_forward(x_big, packed, block_b=512)
    jax.block_until_ready((mu_b, sg_b))
    mu_bref, sg_bref = _reference(x_big, params)
    assert jnp.allclose(mu_b, mu_bref, atol=1e-5), "mu mismatch (B=1024)"
    assert jnp.allclose(sg_b, sg_bref, atol=1e-5), "sigma_sq mismatch (B=1024)"

    # --- non-divisible batch exercising the padding path ---
    x_odd = jax.random.normal(kx3, (1000, NUM_INPUTS), dtype=jnp.float32)
    mu_o, sg_o = policy_forward(x_odd, packed, block_b=512)
    jax.block_until_ready((mu_o, sg_o))
    mu_oref, sg_oref = _reference(x_odd, params)
    assert jnp.allclose(mu_o, mu_oref, atol=1e-5), "mu mismatch (B=1000)"
    assert jnp.allclose(sg_o, sg_oref, atol=1e-5), "sigma_sq mismatch (B=1000)"

    print("KERNEL_OK")
</pallas_src>

<mosaic_0001>
module attributes {stable_mosaic.version = 11 : i64} {
  func.func @_policy_kernel(%arg0: i32, %arg1: memref<2x4xf32, #tpu.memory_space<vmem>>, %arg2: memref<4x32xf32, #tpu.memory_space<vmem>>, %arg3: memref<1x32xf32, #tpu.memory_space<vmem>>, %arg4: memref<32x4xf32, #tpu.memory_space<vmem>>, %arg5: memref<1x4xf32, #tpu.memory_space<vmem>>, %arg6: memref<2x4xf32, #tpu.memory_space<vmem>>) attributes {dimension_semantics = [#tpu.dimension_semantics<parallel>], iteration_bounds = array<i64: 1>, scalar_prefetch = 0 : i64, scratch_operands = 0 : i64, tpu.core_type = #tpu.core_type<tc>, window_params = [{transform_indices = @transform_0, window_bounds = array<i64: 2, 4>}, {pipeline_mode = #tpu.pipeline_mode<synchronous>, transform_indices = @transform_1, window_bounds = array<i64: 4, 32>}, {pipeline_mode = #tpu.pipeline_mode<synchronous>, transform_indices = @transform_2, window_bounds = array<i64: 1, 32>}, {pipeline_mode = #tpu.pipeline_mode<synchronous>, transform_indices = @transform_3, window_bounds = array<i64: 32, 4>}, {pipeline_mode = #tpu.pipeline_mode<synchronous>, transform_indices = @transform_4, window_bounds = array<i64: 1, 4>}, {transform_indices = @transform_5, window_bounds = array<i64: 2, 4>}]} {
    %c0 = arith.constant 0 : index
    %c0_0 = arith.constant 0 : index
    %0 = vector.load %arg1[%c0, %c0_0] : memref<2x4xf32, #tpu.memory_space<vmem>>, vector<2x4xf32>
    %c0_1 = arith.constant 0 : index
    %c0_2 = arith.constant 0 : index
    %1 = vector.load %arg2[%c0_1, %c0_2] : memref<4x32xf32, #tpu.memory_space<vmem>>, vector<4x32xf32>
    %cst = arith.constant dense<0.000000e+00> : vector<2x32xf32>
    %2 = tpu.matmul %0, %1, %cst {dimension_numbers = #tpu.dot_dimension_numbers<[1], [0], [0], [1], [0, 0, 1, 1], [], []>} : vector<2x4xf32>, vector<4x32xf32>, vector<2x32xf32> -> vector<2x32xf32>
    %c0_3 = arith.constant 0 : index
    %c0_4 = arith.constant 0 : index
    %3 = vector.load %arg3[%c0_3, %c0_4] : memref<1x32xf32, #tpu.memory_space<vmem>>, vector<1x32xf32>
    %4 = vector.broadcast %3 : vector<1x32xf32> to vector<2x32xf32>
    %5 = arith.addf %2, %4 : vector<2x32xf32>
    %cst_5 = arith.constant 0.000000e+00 : f32
    %6 = vector.broadcast %cst_5 : f32 to vector<2x32xf32>
    %7 = arith.maximumf %5, %6 : vector<2x32xf32>
    %c0_6 = arith.constant 0 : index
    %c0_7 = arith.constant 0 : index
    %8 = vector.load %arg4[%c0_6, %c0_7] : memref<32x4xf32, #tpu.memory_space<vmem>>, vector<32x4xf32>
    %cst_8 = arith.constant dense<0.000000e+00> : vector<2x4xf32>
    %9 = tpu.matmul %7, %8, %cst_8 {dimension_numbers = #tpu.dot_dimension_numbers<[1], [0], [0], [1], [0, 0, 1, 1], [], []>} : vector<2x32xf32>, vector<32x4xf32>, vector<2x4xf32> -> vector<2x4xf32>
    %c0_9 = arith.constant 0 : index
    %c0_10 = arith.constant 0 : index
    %10 = vector.load %arg5[%c0_9, %c0_10] : memref<1x4xf32, #tpu.memory_space<vmem>>, vector<1x4xf32>
    %11 = vector.broadcast %10 : vector<1x4xf32> to vector<2x4xf32>
    %12 = arith.addf %9, %11 : vector<2x4xf32>
    %c0_11 = arith.constant 0 : index
    %c0_12 = arith.constant 0 : index
    %13 = vector.load %arg6[%c0_11, %c0_12] : memref<2x4xf32, #tpu.memory_space<vmem>>, vector<2x4xf32>
    tpu.vector_store %arg6[%c0_11, %c0_12], %12 {strides = array<i32>} : memref<2x4xf32, #tpu.memory_space<vmem>>, vector<2x4xf32>,
    return
  }
  func.func @transform_0(%arg0: i32) -> (i32, i32) {
    %c0_i32 = arith.constant 0 : i32
    %c0_i32_0 = arith.constant 0 : i32
    return %arg0, %c0_i32 : i32, i32
  }
  func.func @transform_1(%arg0: i32) -> (i32, i32) {
    %c0_i32 = arith.constant 0 : i32
    %c0_i32_0 = arith.constant 0 : i32
    %c0_i32_1 = arith.constant 0 : i32
    return %c0_i32, %c0_i32_0 : i32, i32
  }
  func.func @transform_2(%arg0: i32) -> (i32, i32) {
    %c0_i32 = arith.constant 0 : i32
    %c0_i32_0 = arith.constant 0 : i32
    %c0_i32_1 = arith.constant 0 : i32
    return %c0_i32, %c0_i32_0 : i32, i32
  }
  func.func @transform_3(%arg0: i32) -> (i32, i32) {
    %c0_i32 = arith.constant 0 : i32
    %c0_i32_0 = arith.constant 0 : i32
    %c0_i32_1 = arith.constant 0 : i32
    return %c0_i32, %c0_i32_0 : i32, i32
  }
  func.func @transform_4(%arg0: i32) -> (i32, i32) {
    %c0_i32 = arith.constant 0 : i32
    %c0_i32_0 = arith.constant 0 : i32
    %c0_i32_1 = arith.constant 0 : i32
    return %c0_i32, %c0_i32_0 : i32, i32
  }
  func.func @transform_5(%arg0: i32) -> (i32, i32) {
    %c0_i32 = arith.constant 0 : i32
    %c0_i32_0 = arith.constant 0 : i32
    return %arg0, %c0_i32 : i32, i32
  }
}

</mosaic_0001>

<bundles_post_ra>
// kernel: tpu_custom_call.1
= control target key start
LH: loop header
LB: loop body
LE: loop exit
PB: predicated region body
PF: predicated region fallthrough
CT: control target
= control target key end

     0   :  { %vm34_vm0 = vcmask 1043456   ;;  %vm30_vm1 = vcmask 31744   ;;  %v272_v1 = vmov 0.0   ;;  %vm273_vm2 = vmmov 0   ;;  %s342_s0 = inlined_call_operand.vmem [shape: f32[2,4], index: 0, kind: input, shape index: {}]   ;;  %s343_s1 = inlined_call_operand.vmem [shape: f32[4,32], index: 1, kind: input, shape index: {}]   ;;  %s344_s2 = inlined_call_operand.vmem [shape: f32[1,32], index: 2, kind: input, shape index: {}]   ;;  %s345_s3 = inlined_call_operand.vmem [shape: f32[32,4], index: 3, kind: input, shape index: {}]   ;;  %s346_s4 = inlined_call_operand.vmem [shape: f32[1,4], index: 4, kind: input, shape index: {}]   ;;  %s347_s5 = inlined_call_operand.hbm [shape: f32[2,4], index: 5, kind: output, shape index: {}]  }
   0x1   :  { %v22_v0 = vld [vmem:[%s343_s1] sm:$0xf]  ;;  %222 = vmatprep.subr.mxu0 %v272_v1  ;;  %224 = vmatprep.mubr.msk.f32.mxu0 %vm273_vm2, %v272_v1  ;;  %v110_v4 = vld [vmem:[%s345_s3 + $0x8] sm:$0xff]  ;;  %v274_v5 = vmov 0.0|0.0  }
   0x2   :  { %v21_v2 = vld [vmem:[%s342_s0] sm:$0x3]  ;;  %223 = vmatpush3.msk.msra.mxu0 %vm34_vm0, %v22_v0  ;;  %238 = vmatprep.subr.bf16.mxu1 %v274_v5 }
   0x3   :  { %v109_v3 = vld [vmem:[%s345_s3] sm:$0xff] }
   0x4   :  { %v239_v6 = vpack.c.bf16 %v110_v4, %v109_v3 }
   0x5   :  { %10 = vsyncpa [#allocation3], 0  ;;  %225 = vmatmul.mubr.msk.f32.vlgmr.msra.gmra.mrb[0].mxu0 %vm30_vm1, %v21_v2  ;;  %235 = vmatprep.mubr.msk.f32.mxu1 %vm273_vm2, %v272_v1  ;;  %v111_v7 = vld [vmem:[%s345_s3 + $0x10] sm:$0xff]  ;;  %v112_v8 = vld [vmem:[%s345_s3 + $0x18] sm:$0xff]  ;;  %vm120_vm3 = vcmask 261120   ;;  %s275_s7 = smov [#allocation2]  }
   0x6   :  { %240 = vmatpush3.bf16.msra.mxu1 %v239_v6  ;;  %v242_v9 = vpack.c.bf16 %v112_v8, %v111_v7  ;;  %v210_v10 = vld [vmem:[%s344_s2] ss:$0 sm:$0xff]  ;;  %s202_s8 = sshll.u32 %s275_s7, 4  ;;  %vm194_vm4 = vcmask 25600   ;;  %s203_s8 = int_to_ptr.vmem [resolvable:$true] %s202_s8 }
   0x7   :  { %241 = vmatprep.subr.bf16.mxu1 %v274_v5  ;;  %v213_v15 = vld [vmem:[%s346_s4] ss:$0 sm:$0xff]  ;;  %s248_s3 = scalar_lea.vmem %s203_s8, 32  ;;  %p253_p1 = scmp.lt.s32.totalorder %s203_s8, %s203_s8 }
   0x8   :  { %p249_p0 = scmp.ne.s32.totalorder %s203_s8, %s248_s3  ;;  %p254_p2 = scmp.lt.s32.totalorder %s248_s3, %s248_s3 }
   0xa   :  { %243 = vmatpush3.bf16.msra.mxu1 %v242_v9  ;;  %p255_p3 = por %p254_p2, %p253_p1 }
   0xc   :  { %p256_p4 = pnand %p255_p3, %p249_p0 }
  0xd8   :  { %v104_v11 = vpop.f32.mrb[0].mxu0 }
  0xd9   :  { %v105_v12 = vadd.f32 %v210_v10, %v104_v11  ;;  %v226_v13 = vpop.f32.mrb[1].mxu0 }
  0xdb   :  { %v108_v14 = vmax.f32 %v105_v12, 0.0 }
  0xdd   :  { %236 = vmatmul.mubr.msk.f32.vlgmr.msra.gmra.mrb[0].mxu1 %vm120_vm3, %v108_v14 }
 0x1b0   :  { %v190_v16 = vpop.f32.mrb[0].mxu1 }
 0x1b1   :  { %v191_v17 = vadd.f32 %v213_v15, %v190_v16  ;;  %v237_v18 = vpop.f32.mrb[1].mxu1 }
 0x1b3   :  { %195 = vst.msk [vmem:[#allocation2] sm:$0x3] %vm194_vm4, %v191_v17 }
 0x1b4   :  { %259 = shalt.err (!%p256_p4)
}
 0x1b5   :  { %s260_s10 = scalar_lea.hbm %s347_s5, 32 }
 0x1b6   :  { %p261_p5 = scmp.ne.s32.totalorder %s347_s5, %s260_s10  ;;  %p264_p6 = scmp.lt.u32.totalorder %s260_s10, %s347_s5 }
 0x1b8   :  { %p266_p7 = pnand %p264_p6, %p261_p5 }
 0x1ba   :  { %269 = shalt.err (!%p266_p7)
}
 0x1bb   :  { %205 = dma.vmem_to_hbm [thread:$0]  %s203_s8, 32, %s347_s5, [#allocation3]  }
 0x1bc   :  { %270 = dma.done.wait [#allocation3], 32  }
 0x1bd   :  { %271 = vsyncadd [#allocation3], 4294967264 }
 0x1be   :  { %209 = vsyncpa [#allocation3], 1 }

</bundles_post_ra>
